<compile_context>
chip_gen: v6e
topology: v6e:2x2x1
jax: 0.10.0
libtpu: 0.0.40
codegen_flags: <defaults>
</compile_context>

<pallas_src>
import math
import functools

import jax
import jax.numpy as jnp
from jax.experimental import pallas as pl
from jax.experimental.pallas import tpu as pltpu

MAX_LEN = 2056


def _round_up(x, m):
    return ((x + m - 1) // m) * m


# ----------------------------------------------------------------------------
# Pallas kernel:
#   y = LayerNorm(W3 @ relu(W2 @ relu(W1 @ x + bias1[g]) + b2) + b3)
#   x streamed bf16 row-tiles, weights bf16 resident, f32 accumulation / LN.
#   bias1 is per-group (grid axis 0) — this is how group-constant input
#   features (cross_concat of the timestep embedding) are fused away.
# ----------------------------------------------------------------------------
def _grouped_mlp_ln_kernel(x_ref, bias1_ref, w1_ref, w2_ref, b2_ref,
                           w3_ref, b3_ref, g_ref, beta_ref, o_ref):
    x = x_ref[0]                                          # (T, d_in) bf16
    h = jnp.dot(x, w1_ref[...], preferred_element_type=jnp.float32)
    h = h + bias1_ref[0]                                  # (T, d_hid) f32
    h = jnp.maximum(h, 0.0)
    h = jnp.dot(h.astype(w2_ref.dtype), w2_ref[...],
                preferred_element_type=jnp.float32) + b2_ref[...]
    h = jnp.maximum(h, 0.0)
    h = jnp.dot(h.astype(w3_ref.dtype), w3_ref[...],
                preferred_element_type=jnp.float32) + b3_ref[...]

    # LayerNorm over last dim (PyTorch default eps=1e-5, elementwise affine),
    # statistics in f32.
    mean = jnp.mean(h, axis=-1, keepdims=True)
    var = jnp.mean((h - mean) ** 2, axis=-1, keepdims=True)
    h = (h - mean) * jax.lax.rsqrt(var + 1e-5)
    # TODO(synk): pack the (T, d_hid) result into a lane-dense (T*d_hid/128, 128)
    # slab before the store to avoid masked vst at d_hid < 128 lanes.
    o_ref[0] = (h * g_ref[...] + beta_ref[...]).astype(o_ref.dtype)


def grouped_mlp_layernorm(x, bias1, w1, w2, b2, w3, b3, gamma, beta,
                          *, tile_rows=1024):
    """x: (G, R, d_in). bias1: (G, 1, d_hid). Returns (G, R, d_hid) float32."""
    G, R, d_in = x.shape
    d_hid = w1.shape[1]

    # bf16 on the HBM-heavy stream and the MXU operands; f32 everywhere else.
    x = x.astype(jnp.bfloat16)
    w1 = w1.astype(jnp.bfloat16)
    w2 = w2.astype(jnp.bfloat16)
    w3 = w3.astype(jnp.bfloat16)
    bias1 = bias1.astype(jnp.float32)
    b2 = b2.astype(jnp.float32)
    b3 = b3.astype(jnp.float32)
    gamma = gamma.astype(jnp.float32)
    beta = beta.astype(jnp.float32)

    # Large row tiles (sweepable).  No padded copy: the grid is cdiv-based and
    # the ragged tail block (if any) is computed and discarded by Pallas.
    tile = min(tile_rows, _round_up(R, 8))
    grid = (G, pl.cdiv(R, tile))

    res2d = lambda shape: pl.BlockSpec(shape, lambda g, r: (0, 0))

    out = pl.pallas_call(
        _grouped_mlp_ln_kernel,
        out_shape=jax.ShapeDtypeStruct((G, R, d_hid), jnp.float32),
        grid_spec=pltpu.PrefetchScalarGridSpec(
            num_scalar_prefetch=0,
            grid=grid,
            in_specs=[
                pl.BlockSpec((1, tile, d_in), lambda g, r: (g, r, 0)),   # x
                pl.BlockSpec((1, 1, d_hid), lambda g, r: (g, 0, 0)),     # bias1
                res2d((d_in, d_hid)),      # w1
                res2d((d_hid, d_hid)),     # w2
                res2d((1, d_hid)),         # b2
                res2d((d_hid, d_hid)),     # w3
                res2d((1, d_hid)),         # b3
                res2d((1, d_hid)),         # gamma
                res2d((1, d_hid)),         # beta
            ],
            out_specs=pl.BlockSpec((1, tile, d_hid), lambda g, r: (g, r, 0)),
        ),
        compiler_params=pltpu.CompilerParams(
            dimension_semantics=("parallel", "parallel")),
    )(x, bias1, w1, w2, b2, w3, b3, gamma, beta)
    return out


# ----------------------------------------------------------------------------
# Plain-JAX glue: positional / timestep embeddings (match torch reference)
# ----------------------------------------------------------------------------
def get_index_embedding(indices, embed_size, max_len=MAX_LEN):
    indices = indices.astype(jnp.float32)
    K = jnp.arange(embed_size // 2, dtype=jnp.float32)
    scale = math.pi / (max_len ** (2.0 * K / embed_size))
    ang = indices[..., None] * scale[None]
    return jnp.concatenate([jnp.sin(ang), jnp.cos(ang)], axis=-1)


def get_timestep_embedding(timesteps, embedding_dim, max_positions=10000):
    assert timesteps.ndim == 1
    timesteps = timesteps * max_positions
    half_dim = embedding_dim // 2
    emb = math.log(max_positions) / (half_dim - 1)
    emb = jnp.exp(jnp.arange(half_dim, dtype=jnp.float32) * -emb)
    emb = timesteps.astype(jnp.float32)[:, None] * emb[None, :]
    emb = jnp.concatenate([jnp.sin(emb), jnp.cos(emb)], axis=1)
    if embedding_dim % 2 == 1:
        emb = jnp.pad(emb, ((0, 0), (0, 1)))
    return emb


def cross_concat(feats_1d, num_batch, num_res):
    a = jnp.broadcast_to(feats_1d[:, :, None, :],
                         (num_batch, num_res, num_res, feats_1d.shape[-1]))
    b = jnp.broadcast_to(feats_1d[:, None, :, :],
                         (num_batch, num_res, num_res, feats_1d.shape[-1]))
    return jnp.concatenate([a, b], axis=-1).astype(jnp.float32).reshape(
        num_batch, num_res * num_res, -1)


# ----------------------------------------------------------------------------
# Parameter construction (deterministic, mimics nn.Linear / nn.LayerNorm init)
# ----------------------------------------------------------------------------
def _linear_params(key, d_in, d_out):
    k_w, k_b = jax.random.split(key)
    bound = 1.0 / math.sqrt(d_in)
    w = jax.random.uniform(k_w, (d_in, d_out), jnp.float32, -bound, bound)
    b = jax.random.uniform(k_b, (1, d_out), jnp.float32, -bound, bound)
    return w, b


def make_mlp_params(key, d_in, d_hid):
    k1, k2, k3 = jax.random.split(key, 3)
    w1, b1 = _linear_params(k1, d_in, d_hid)
    w2, b2 = _linear_params(k2, d_hid, d_hid)
    w3, b3 = _linear_params(k3, d_hid, d_hid)
    return dict(w1=w1, b1=b1, w2=w2, b2=b2, w3=w3, b3=b3,
                gamma=jnp.ones((1, d_hid), jnp.float32),
                beta=jnp.zeros((1, d_hid), jnp.float32))


# ----------------------------------------------------------------------------
# Embedder forward
# ----------------------------------------------------------------------------
def embedder_forward(seq_idx, t, mar_encoder_output, node_params, edge_params,
                     *, index_embed_size, tile_rows=1024):
    num_batch, num_res = seq_idx.shape
    E = index_embed_size

    t_embed = get_timestep_embedding(t, E)                       # (B, E) f32
    prot_t_embed = jnp.broadcast_to(t_embed[:, None, :],
                                    (num_batch, num_res, E))

    # ---- node path: x = [t_embed | idx_emb(seq_idx) | mar] streamed bf16 ----
    node_in = jnp.concatenate(
        [prot_t_embed, get_index_embedding(seq_idx, E),
         mar_encoder_output.astype(jnp.float32)], axis=-1)
    node_in = node_in.reshape(1, num_batch * num_res, -1)
    node_bias1 = node_params["b1"].reshape(1, 1, -1)
    node_embed = grouped_mlp_layernorm(
        node_in, node_bias1,
        node_params["w1"], node_params["w2"], node_params["b2"],
        node_params["w3"], node_params["b3"],
        node_params["gamma"], node_params["beta"], tile_rows=tile_rows)
    node_embed = node_embed.reshape(num_batch, num_res, -1)

    # ---- edge path (fused): edge_in = [t_embed[b] | t_embed[b] | idx_emb(rel)].
    # The batch-constant cross_concat(t_embed) block is folded into a per-batch
    # first-layer bias, so only the E-wide relative index embedding is streamed.
    w1e = edge_params["w1"]                                      # (3E, d_e)
    edge_bias1 = t_embed @ (w1e[:E] + w1e[E:2 * E]) + edge_params["b1"]
    edge_bias1 = edge_bias1[:, None, :]                          # (B, 1, d_e)

    rel = (seq_idx[:, :, None] - seq_idx[:, None, :]).reshape(
        num_batch, num_res * num_res)
    # TODO(synk): move this sin/cos index embedding onto the in-kernel EUP and
    # stream only `rel` (4 B/row) once in-kernel sin/cos lowering is verified.
    edge_x = get_index_embedding(rel, E)                         # (B, N^2, E)
    edge_embed = grouped_mlp_layernorm(
        edge_x, edge_bias1,
        w1e[2 * E:], edge_params["w2"], edge_params["b2"],
        edge_params["w3"], edge_params["b3"],
        edge_params["gamma"], edge_params["beta"], tile_rows=tile_rows)
    edge_embed = edge_embed.reshape(num_batch, num_res, num_res, -1)

    return node_embed, edge_embed


# ----------------------------------------------------------------------------
# Pure-JAX f32 reference (for correctness check)
# ----------------------------------------------------------------------------
def _mlp_ln_ref(x, p):
    h = jnp.maximum(x @ p["w1"] + p["b1"], 0.0)
    h = jnp.maximum(h @ p["w2"] + p["b2"], 0.0)
    h = h @ p["w3"] + p["b3"]
    mean = jnp.mean(h, axis=-1, keepdims=True)
    var = jnp.mean((h - mean) ** 2, axis=-1, keepdims=True)
    return (h - mean) * jax.lax.rsqrt(var + 1e-5) * p["gamma"] + p["beta"]


if __name__ == "__main__":
    # small config consistent with the module
    index_embed_size = 32          # _embed_conf.index_embed_size
    node_embed_size = 64           # model_conf.node_embed_size
    edge_embed_size = 32           # model_conf.edge_embed_size
    mar_encoder_embed_dim = 16
    num_batch, num_res = 2, 8

    node_in_dim = 2 * index_embed_size + mar_encoder_embed_dim   # 80
    edge_in_dim = 3 * index_embed_size                           # 96

    key = jax.random.PRNGKey(0)
    k_node, k_edge, k_seq, k_t, k_mar = jax.random.split(key, 5)

    node_params = make_mlp_params(k_node, node_in_dim, node_embed_size)
    edge_params = make_mlp_params(k_edge, edge_in_dim, edge_embed_size)

    seq_idx = jax.random.randint(k_seq, (num_batch, num_res), 0, 2056,
                                 dtype=jnp.int32)
    t = jax.random.uniform(k_t, (num_batch,), jnp.float32)
    mar_encoder_output = jax.random.normal(
        k_mar, (num_batch, num_res, mar_encoder_embed_dim), jnp.float32)

    fwd = jax.jit(functools.partial(embedder_forward,
                                    index_embed_size=index_embed_size))
    node_embed, edge_embed = fwd(seq_idx, t, mar_encoder_output,
                                 node_params, edge_params)
    jax.block_until_ready((node_embed, edge_embed))

    assert node_embed.shape == (num_batch, num_res, node_embed_size)
    assert edge_embed.shape == (num_batch, num_res, num_res, edge_embed_size)

    # correctness vs. full-f32 pure-JAX reference (tolerance sized for bf16
    # weights/activations with f32 accumulation)
    t_embed = get_timestep_embedding(t, index_embed_size)
    prot_t = jnp.broadcast_to(t_embed[:, None, :],
                              (num_batch, num_res, index_embed_size))
    node_in = jnp.concatenate(
        [prot_t, get_index_embedding(seq_idx, index_embed_size),
         mar_encoder_output], -1).reshape(num_batch * num_res, -1)
    rel = (seq_idx[:, :, None] - seq_idx[:, None, :]).reshape(
        num_batch, num_res * num_res)
    edge_in = jnp.concatenate(
        [cross_concat(prot_t, num_batch, num_res),
         get_index_embedding(rel, index_embed_size)],
        -1).reshape(num_batch * num_res * num_res, -1)
    node_ref = _mlp_ln_ref(node_in, node_params).reshape(node_embed.shape)
    edge_ref = _mlp_ln_ref(edge_in, edge_params).reshape(edge_embed.shape)

    assert jnp.allclose(node_embed, node_ref, atol=5e-2, rtol=5e-2)
    assert jnp.allclose(edge_embed, edge_ref, atol=5e-2, rtol=5e-2)

    print("KERNEL_OK")
</pallas_src>

<mosaic_0001>
module attributes {stable_mosaic.version = 11 : i64} {
  func.func @_grouped_mlp_ln_kernel(%arg0: i32, %arg1: i32, %arg2: memref<1x64x32xbf16, #tpu.memory_space<vmem>>, %arg3: memref<1x1x32xf32, #tpu.memory_space<vmem>>, %arg4: memref<32x32xbf16, #tpu.memory_space<vmem>>, %arg5: memref<32x32xbf16, #tpu.memory_space<vmem>>, %arg6: memref<1x32xf32, #tpu.memory_space<vmem>>, %arg7: memref<32x32xbf16, #tpu.memory_space<vmem>>, %arg8: memref<1x32xf32, #tpu.memory_space<vmem>>, %arg9: memref<1x32xf32, #tpu.memory_space<vmem>>, %arg10: memref<1x32xf32, #tpu.memory_space<vmem>>, %arg11: memref<1x64x32xf32, #tpu.memory_space<vmem>>) attributes {dimension_semantics = [#tpu.dimension_semantics<parallel>, #tpu.dimension_semantics<parallel>], iteration_bounds = array<i64: 2, 1>, scalar_prefetch = 0 : i64, scratch_operands = 0 : i64, tpu.core_type = #tpu.core_type<tc>, window_params = [{transform_indices = @transform_0, window_bounds = array<i64: 1, 64, 32>}, {transform_indices = @transform_1, window_bounds = array<i64: 1, 1, 32>}, {pipeline_mode = #tpu.pipeline_mode<synchronous>, transform_indices = @transform_2, window_bounds = array<i64: 32, 32>}, {pipeline_mode = #tpu.pipeline_mode<synchronous>, transform_indices = @transform_3, window_bounds = array<i64: 32, 32>}, {pipeline_mode = #tpu.pipeline_mode<synchronous>, transform_indices = @transform_4, window_bounds = array<i64: 1, 32>}, {pipeline_mode = #tpu.pipeline_mode<synchronous>, transform_indices = @transform_5, window_bounds = array<i64: 32, 32>}, {pipeline_mode = #tpu.pipeline_mode<synchronous>, transform_indices = @transform_6, window_bounds = array<i64: 1, 32>}, {pipeline_mode = #tpu.pipeline_mode<synchronous>, transform_indices = @transform_7, window_bounds = array<i64: 1, 32>}, {pipeline_mode = #tpu.pipeline_mode<synchronous>, transform_indices = @transform_8, window_bounds = array<i64: 1, 32>}, {transform_indices = @transform_9, window_bounds = array<i64: 1, 64, 32>}]} {
    %c0 = arith.constant 0 : index
    %c0_0 = arith.constant 0 : index
    %c0_1 = arith.constant 0 : index
    %0 = vector.load %arg2[%c0, %c0_0, %c0_1] : memref<1x64x32xbf16, #tpu.memory_space<vmem>>, vector<1x64x32xbf16>
    %1 = vector.shape_cast %0 : vector<1x64x32xbf16> to vector<64x32xbf16>
    %c0_2 = arith.constant 0 : index
    %c0_3 = arith.constant 0 : index
    %2 = vector.load %arg4[%c0_2, %c0_3] : memref<32x32xbf16, #tpu.memory_space<vmem>>, vector<32x32xbf16>
    %cst = arith.constant dense<0.000000e+00> : vector<64x32xf32>
    %3 = tpu.matmul %1, %2, %cst {dimension_numbers = #tpu.dot_dimension_numbers<[1], [0], [0], [1], [0, 0, 1, 1], [], []>} : vector<64x32xbf16>, vector<32x32xbf16>, vector<64x32xf32> -> vector<64x32xf32>
    %c0_4 = arith.constant 0 : index
    %c0_5 = arith.constant 0 : index
    %c0_6 = arith.constant 0 : index
    %4 = vector.load %arg3[%c0_4, %c0_5, %c0_6] : memref<1x1x32xf32, #tpu.memory_space<vmem>>, vector<1x1x32xf32>
    %5 = vector.shape_cast %4 : vector<1x1x32xf32> to vector<1x32xf32>
    %6 = vector.broadcast %5 : vector<1x32xf32> to vector<64x32xf32>
    %7 = arith.addf %3, %6 : vector<64x32xf32>
    %cst_7 = arith.constant 0.000000e+00 : f32
    %8 = vector.broadcast %cst_7 : f32 to vector<64x32xf32>
    %9 = arith.maximumf %7, %8 : vector<64x32xf32>
    %10 = arith.truncf %9 : vector<64x32xf32> to vector<64x32xbf16>
    %c0_8 = arith.constant 0 : index
    %c0_9 = arith.constant 0 : index
    %11 = vector.load %arg5[%c0_8, %c0_9] : memref<32x32xbf16, #tpu.memory_space<vmem>>, vector<32x32xbf16>
    %cst_10 = arith.constant dense<0.000000e+00> : vector<64x32xf32>
    %12 = tpu.matmul %10, %11, %cst_10 {dimension_numbers = #tpu.dot_dimension_numbers<[1], [0], [0], [1], [0, 0, 1, 1], [], []>} : vector<64x32xbf16>, vector<32x32xbf16>, vector<64x32xf32> -> vector<64x32xf32>
    %c0_11 = arith.constant 0 : index
    %c0_12 = arith.constant 0 : index
    %13 = vector.load %arg6[%c0_11, %c0_12] : memref<1x32xf32, #tpu.memory_space<vmem>>, vector<1x32xf32>
    %14 = vector.broadcast %13 : vector<1x32xf32> to vector<64x32xf32>
    %15 = arith.addf %12, %14 : vector<64x32xf32>
    %cst_13 = arith.constant 0.000000e+00 : f32
    %16 = vector.broadcast %cst_13 : f32 to vector<64x32xf32>
    %17 = arith.maximumf %15, %16 : vector<64x32xf32>
    %18 = arith.truncf %17 : vector<64x32xf32> to vector<64x32xbf16>
    %c0_14 = arith.constant 0 : index
    %c0_15 = arith.constant 0 : index
    %19 = vector.load %arg7[%c0_14, %c0_15] : memref<32x32xbf16, #tpu.memory_space<vmem>>, vector<32x32xbf16>
    %cst_16 = arith.constant dense<0.000000e+00> : vector<64x32xf32>
    %20 = tpu.matmul %18, %19, %cst_16 {dimension_numbers = #tpu.dot_dimension_numbers<[1], [0], [0], [1], [0, 0, 1, 1], [], []>} : vector<64x32xbf16>, vector<32x32xbf16>, vector<64x32xf32> -> vector<64x32xf32>
    %c0_17 = arith.constant 0 : index
    %c0_18 = arith.constant 0 : index
    %21 = vector.load %arg8[%c0_17, %c0_18] : memref<1x32xf32, #tpu.memory_space<vmem>>, vector<1x32xf32>
    %22 = vector.broadcast %21 : vector<1x32xf32> to vector<64x32xf32>
    %23 = arith.addf %20, %22 : vector<64x32xf32>
    %cst_19 = arith.constant dense<0.000000e+00> : vector<64xf32>
    %24 = vector.multi_reduction <add>, %23, %cst_19 [1] : vector<64x32xf32> to vector<64xf32>
    %25 = vector.shape_cast %24 : vector<64xf32> to vector<64x1xf32>
    %cst_20 = arith.constant 3.200000e+01 : f32
    %26 = vector.broadcast %cst_20 : f32 to vector<64x1xf32>
    %27 = arith.divf %25, %26 : vector<64x1xf32>
    %28 = vector.broadcast %27 : vector<64x1xf32> to vector<64x32xf32>
    %29 = arith.subf %23, %28 : vector<64x32xf32>
    %30 = arith.mulf %29, %29 : vector<64x32xf32>
    %cst_21 = arith.constant dense<0.000000e+00> : vector<64xf32>
    %31 = vector.multi_reduction <add>, %30, %cst_21 [1] : vector<64x32xf32> to vector<64xf32>
    %32 = vector.shape_cast %31 : vector<64xf32> to vector<64x1xf32>
    %cst_22 = arith.constant 3.200000e+01 : f32
    %33 = vector.broadcast %cst_22 : f32 to vector<64x1xf32>
    %34 = arith.divf %32, %33 : vector<64x1xf32>
    %35 = vector.broadcast %27 : vector<64x1xf32> to vector<64x32xf32>
    %36 = arith.subf %23, %35 : vector<64x32xf32>
    %cst_23 = arith.constant 9.99999974E-6 : f32
    %37 = vector.broadcast %cst_23 : f32 to vector<64x1xf32>
    %38 = arith.addf %34, %37 : vector<64x1xf32>
    %39 = math.rsqrt %38 : vector<64x1xf32>
    %40 = vector.broadcast %39 : vector<64x1xf32> to vector<64x32xf32>
    %41 = arith.mulf %36, %40 : vector<64x32xf32>
    %c0_24 = arith.constant 0 : index
    %c0_25 = arith.constant 0 : index
    %42 = vector.load %arg9[%c0_24, %c0_25] : memref<1x32xf32, #tpu.memory_space<vmem>>, vector<1x32xf32>
    %43 = vector.broadcast %42 : vector<1x32xf32> to vector<64x32xf32>
    %44 = arith.mulf %41, %43 : vector<64x32xf32>
    %c0_26 = arith.constant 0 : index
    %c0_27 = arith.constant 0 : index
    %45 = vector.load %arg10[%c0_26, %c0_27] : memref<1x32xf32, #tpu.memory_space<vmem>>, vector<1x32xf32>
    %46 = vector.broadcast %45 : vector<1x32xf32> to vector<64x32xf32>
    %47 = arith.addf %44, %46 : vector<64x32xf32>
    %c0_28 = arith.constant 0 : index
    %c0_29 = arith.constant 0 : index
    %c0_30 = arith.constant 0 : index
    %48 = vector.load %arg11[%c0_28, %c0_29, %c0_30] : memref<1x64x32xf32, #tpu.memory_space<vmem>>, vector<1x64x32xf32>
    %49 = vector.shape_cast %48 : vector<1x64x32xf32> to vector<64x32xf32>
    %50 = vector.shape_cast %47 : vector<64x32xf32> to vector<1x64x32xf32>
    tpu.vector_store %arg11[%c0_28, %c0_29, %c0_30], %50 {strides = array<i32>} : memref<1x64x32xf32, #tpu.memory_space<vmem>>, vector<1x64x32xf32>,
    return
  }
  func.func @transform_0(%arg0: i32, %arg1: i32) -> (i32, i32, i32) {
    %c0_i32 = arith.constant 0 : i32
    %c0_i32_0 = arith.constant 0 : i32
    return %arg0, %arg1, %c0_i32 : i32, i32, i32
  }
  func.func @transform_1(%arg0: i32, %arg1: i32) -> (i32, i32, i32) {
    %c0_i32 = arith.constant 0 : i32
    %c0_i32_0 = arith.constant 0 : i32
    %c0_i32_1 = arith.constant 0 : i32
    return %arg0, %c0_i32, %c0_i32_0 : i32, i32, i32
  }
  func.func @transform_2(%arg0: i32, %arg1: i32) -> (i32, i32) {
    %c0_i32 = arith.constant 0 : i32
    %c0_i32_0 = arith.constant 0 : i32
    %c0_i32_1 = arith.constant 0 : i32
    return %c0_i32, %c0_i32_0 : i32, i32
  }
  func.func @transform_3(%arg0: i32, %arg1: i32) -> (i32, i32) {
    %c0_i32 = arith.constant 0 : i32
    %c0_i32_0 = arith.constant 0 : i32
    %c0_i32_1 = arith.constant 0 : i32
    return %c0_i32, %c0_i32_0 : i32, i32
  }
  func.func @transform_4(%arg0: i32, %arg1: i32) -> (i32, i32) {
    %c0_i32 = arith.constant 0 : i32
    %c0_i32_0 = arith.constant 0 : i32
    %c0_i32_1 = arith.constant 0 : i32
    return %c0_i32, %c0_i32_0 : i32, i32
  }
  func.func @transform_5(%arg0: i32, %arg1: i32) -> (i32, i32) {
    %c0_i32 = arith.constant 0 : i32
    %c0_i32_0 = arith.constant 0 : i32
    %c0_i32_1 = arith.constant 0 : i32
    return %c0_i32, %c0_i32_0 : i32, i32
  }
  func.func @transform_6(%arg0: i32, %arg1: i32) -> (i32, i32) {
    %c0_i32 = arith.constant 0 : i32
    %c0_i32_0 = arith.constant 0 : i32
    %c0_i32_1 = arith.constant 0 : i32
    return %c0_i32, %c0_i32_0 : i32, i32
  }
  func.func @transform_7(%arg0: i32, %arg1: i32) -> (i32, i32) {
    %c0_i32 = arith.constant 0 : i32
    %c0_i32_0 = arith.constant 0 : i32
    %c0_i32_1 = arith.constant 0 : i32
    return %c0_i32, %c0_i32_0 : i32, i32
  }
  func.func @transform_8(%arg0: i32, %arg1: i32) -> (i32, i32) {
    %c0_i32 = arith.constant 0 : i32
    %c0_i32_0 = arith.constant 0 : i32
    %c0_i32_1 = arith.constant 0 : i32
    return %c0_i32, %c0_i32_0 : i32, i32
  }
  func.func @transform_9(%arg0: i32, %arg1: i32) -> (i32, i32, i32) {
    %c0_i32 = arith.constant 0 : i32
    %c0_i32_0 = arith.constant 0 : i32
    return %arg0, %arg1, %c0_i32 : i32, i32, i32
  }
}

module attributes {stable_mosaic.version = 11 : i64} {
  func.func @_grouped_mlp_ln_kernel(%arg0: i32, %arg1: i32, %arg2: memref<1x16x80xbf16, #tpu.memory_space<vmem>>, %arg3: memref<1x1x64xf32, #tpu.memory_space<vmem>>, %arg4: memref<80x64xbf16, #tpu.memory_space<vmem>>, %arg5: memref<64x64xbf16, #tpu.memory_space<vmem>>, %arg6: memref<1x64xf32, #tpu.memory_space<vmem>>, %arg7: memref<64x64xbf16, #tpu.memory_space<vmem>>, %arg8: memref<1x64xf32, #tpu.memory_space<vmem>>, %arg9: memref<1x64xf32, #tpu.memory_space<vmem>>, %arg10: memref<1x64xf32, #tpu.memory_space<vmem>>, %arg11: memref<1x16x64xf32, #tpu.memory_space<vmem>>) attributes {dimension_semantics = [#tpu.dimension_semantics<parallel>, #tpu.dimension_semantics<parallel>], iteration_bounds = array<i64: 1, 1>, scalar_prefetch = 0 : i64, scratch_operands = 0 : i64, tpu.core_type = #tpu.core_type<tc>, window_params = [{transform_indices = @transform_0, window_bounds = array<i64: 1, 16, 80>}, {transform_indices = @transform_1, window_bounds = array<i64: 1, 1, 64>}, {pipeline_mode = #tpu.pipeline_mode<synchronous>, transform_indices = @transform_2, window_bounds = array<i64: 80, 64>}, {pipeline_mode = #tpu.pipeline_mode<synchronous>, transform_indices = @transform_3, window_bounds = array<i64: 64, 64>}, {pipeline_mode = #tpu.pipeline_mode<synchronous>, transform_indices = @transform_4, window_bounds = array<i64: 1, 64>}, {pipeline_mode = #tpu.pipeline_mode<synchronous>, transform_indices = @transform_5, window_bounds = array<i64: 64, 64>}, {pipeline_mode = #tpu.pipeline_mode<synchronous>, transform_indices = @transform_6, window_bounds = array<i64: 1, 64>}, {pipeline_mode = #tpu.pipeline_mode<synchronous>, transform_indices = @transform_7, window_bounds = array<i64: 1, 64>}, {pipeline_mode = #tpu.pipeline_mode<synchronous>, transform_indices = @transform_8, window_bounds = array<i64: 1, 64>}, {transform_indices = @transform_9, window_bounds = array<i64: 1, 16, 64>}]} {
    %c0 = arith.constant 0 : index
    %c0_0 = arith.constant 0 : index
    %c0_1 = arith.constant 0 : index
    %0 = vector.load %arg2[%c0, %c0_0, %c0_1] : memref<1x16x80xbf16, #tpu.memory_space<vmem>>, vector<1x16x80xbf16>
    %1 = vector.shape_cast %0 : vector<1x16x80xbf16> to vector<16x80xbf16>
    %c0_2 = arith.constant 0 : index
    %c0_3 = arith.constant 0 : index
    %2 = vector.load %arg4[%c0_2, %c0_3] : memref<80x64xbf16, #tpu.memory_space<vmem>>, vector<80x64xbf16>
    %cst = arith.constant dense<0.000000e+00> : vector<16x64xf32>
    %3 = tpu.matmul %1, %2, %cst {dimension_numbers = #tpu.dot_dimension_numbers<[1], [0], [0], [1], [0, 0, 1, 1], [], []>} : vector<16x80xbf16>, vector<80x64xbf16>, vector<16x64xf32> -> vector<16x64xf32>
    %c0_4 = arith.constant 0 : index
    %c0_5 = arith.constant 0 : index
    %c0_6 = arith.constant 0 : index
    %4 = vector.load %arg3[%c0_4, %c0_5, %c0_6] : memref<1x1x64xf32, #tpu.memory_space<vmem>>, vector<1x1x64xf32>
    %5 = vector.shape_cast %4 : vector<1x1x64xf32> to vector<1x64xf32>
    %6 = vector.broadcast %5 : vector<1x64xf32> to vector<16x64xf32>
    %7 = arith.addf %3, %6 : vector<16x64xf32>
    %cst_7 = arith.constant 0.000000e+00 : f32
    %8 = vector.broadcast %cst_7 : f32 to vector<16x64xf32>
    %9 = arith.maximumf %7, %8 : vector<16x64xf32>
    %10 = arith.truncf %9 : vector<16x64xf32> to vector<16x64xbf16>
    %c0_8 = arith.constant 0 : index
    %c0_9 = arith.constant 0 : index
    %11 = vector.load %arg5[%c0_8, %c0_9] : memref<64x64xbf16, #tpu.memory_space<vmem>>, vector<64x64xbf16>
    %cst_10 = arith.constant dense<0.000000e+00> : vector<16x64xf32>
    %12 = tpu.matmul %10, %11, %cst_10 {dimension_numbers = #tpu.dot_dimension_numbers<[1], [0], [0], [1], [0, 0, 1, 1], [], []>} : vector<16x64xbf16>, vector<64x64xbf16>, vector<16x64xf32> -> vector<16x64xf32>
    %c0_11 = arith.constant 0 : index
    %c0_12 = arith.constant 0 : index
    %13 = vector.load %arg6[%c0_11, %c0_12] : memref<1x64xf32, #tpu.memory_space<vmem>>, vector<1x64xf32>
    %14 = vector.broadcast %13 : vector<1x64xf32> to vector<16x64xf32>
    %15 = arith.addf %12, %14 : vector<16x64xf32>
    %cst_13 = arith.constant 0.000000e+00 : f32
    %16 = vector.broadcast %cst_13 : f32 to vector<16x64xf32>
    %17 = arith.maximumf %15, %16 : vector<16x64xf32>
    %18 = arith.truncf %17 : vector<16x64xf32> to vector<16x64xbf16>
    %c0_14 = arith.constant 0 : index
    %c0_15 = arith.constant 0 : index
    %19 = vector.load %arg7[%c0_14, %c0_15] : memref<64x64xbf16, #tpu.memory_space<vmem>>, vector<64x64xbf16>
    %cst_16 = arith.constant dense<0.000000e+00> : vector<16x64xf32>
    %20 = tpu.matmul %18, %19, %cst_16 {dimension_numbers = #tpu.dot_dimension_numbers<[1], [0], [0], [1], [0, 0, 1, 1], [], []>} : vector<16x64xbf16>, vector<64x64xbf16>, vector<16x64xf32> -> vector<16x64xf32>
    %c0_17 = arith.constant 0 : index
    %c0_18 = arith.constant 0 : index
    %21 = vector.load %arg8[%c0_17, %c0_18] : memref<1x64xf32, #tpu.memory_space<vmem>>, vector<1x64xf32>
    %22 = vector.broadcast %21 : vector<1x64xf32> to vector<16x64xf32>
    %23 = arith.addf %20, %22 : vector<16x64xf32>
    %cst_19 = arith.constant dense<0.000000e+00> : vector<16xf32>
    %24 = vector.multi_reduction <add>, %23, %cst_19 [1] : vector<16x64xf32> to vector<16xf32>
    %25 = vector.shape_cast %24 : vector<16xf32> to vector<16x1xf32>
    %cst_20 = arith.constant 6.400000e+01 : f32
    %26 = vector.broadcast %cst_20 : f32 to vector<16x1xf32>
    %27 = arith.divf %25, %26 : vector<16x1xf32>
    %28 = vector.broadcast %27 : vector<16x1xf32> to vector<16x64xf32>
    %29 = arith.subf %23, %28 : vector<16x64xf32>
    %30 = arith.mulf %29, %29 : vector<16x64xf32>
    %cst_21 = arith.constant dense<0.000000e+00> : vector<16xf32>
    %31 = vector.multi_reduction <add>, %30, %cst_21 [1] : vector<16x64xf32> to vector<16xf32>
    %32 = vector.shape_cast %31 : vector<16xf32> to vector<16x1xf32>
    %cst_22 = arith.constant 6.400000e+01 : f32
    %33 = vector.broadcast %cst_22 : f32 to vector<16x1xf32>
    %34 = arith.divf %32, %33 : vector<16x1xf32>
    %35 = vector.broadcast %27 : vector<16x1xf32> to vector<16x64xf32>
    %36 = arith.subf %23, %35 : vector<16x64xf32>
    %cst_23 = arith.constant 9.99999974E-6 : f32
    %37 = vector.broadcast %cst_23 : f32 to vector<16x1xf32>
    %38 = arith.addf %34, %37 : vector<16x1xf32>
    %39 = math.rsqrt %38 : vector<16x1xf32>
    %40 = vector.broadcast %39 : vector<16x1xf32> to vector<16x64xf32>
    %41 = arith.mulf %36, %40 : vector<16x64xf32>
    %c0_24 = arith.constant 0 : index
    %c0_25 = arith.constant 0 : index
    %42 = vector.load %arg9[%c0_24, %c0_25] : memref<1x64xf32, #tpu.memory_space<vmem>>, vector<1x64xf32>
    %43 = vector.broadcast %42 : vector<1x64xf32> to vector<16x64xf32>
    %44 = arith.mulf %41, %43 : vector<16x64xf32>
    %c0_26 = arith.constant 0 : index
    %c0_27 = arith.constant 0 : index
    %45 = vector.load %arg10[%c0_26, %c0_27] : memref<1x64xf32, #tpu.memory_space<vmem>>, vector<1x64xf32>
    %46 = vector.broadcast %45 : vector<1x64xf32> to vector<16x64xf32>
    %47 = arith.addf %44, %46 : vector<16x64xf32>
    %c0_28 = arith.constant 0 : index
    %c0_29 = arith.constant 0 : index
    %c0_30 = arith.constant 0 : index
    %48 = vector.load %arg11[%c0_28, %c0_29, %c0_30] : memref<1x16x64xf32, #tpu.memory_space<vmem>>, vector<1x16x64xf32>
    %49 = vector.shape_cast %48 : vector<1x16x64xf32> to vector<16x64xf32>
    %50 = vector.shape_cast %47 : vector<16x64xf32> to vector<1x16x64xf32>
    tpu.vector_store %arg11[%c0_28, %c0_29, %c0_30], %50 {strides = array<i32>} : memref<1x16x64xf32, #tpu.memory_space<vmem>>, vector<1x16x64xf32>,
    return
  }
  func.func @transform_0(%arg0: i32, %arg1: i32) -> (i32, i32, i32) {
    %c0_i32 = arith.constant 0 : i32
    %c0_i32_0 = arith.constant 0 : i32
    return %arg0, %arg1, %c0_i32 : i32, i32, i32
  }
  func.func @transform_1(%arg0: i32, %arg1: i32) -> (i32, i32, i32) {
    %c0_i32 = arith.constant 0 : i32
    %c0_i32_0 = arith.constant 0 : i32
    %c0_i32_1 = arith.constant 0 : i32
    return %arg0, %c0_i32, %c0_i32_0 : i32, i32, i32
  }
  func.func @transform_2(%arg0: i32, %arg1: i32) -> (i32, i32) {
    %c0_i32 = arith.constant 0 : i32
    %c0_i32_0 = arith.constant 0 : i32
    %c0_i32_1 = arith.constant 0 : i32
    return %c0_i32, %c0_i32_0 : i32, i32
  }
  func.func @transform_3(%arg0: i32, %arg1: i32) -> (i32, i32) {
    %c0_i32 = arith.constant 0 : i32
    %c0_i32_0 = arith.constant 0 : i32
    %c0_i32_1 = arith.constant 0 : i32
    return %c0_i32, %c0_i32_0 : i32, i32
  }
  func.func @transform_4(%arg0: i32, %arg1: i32) -> (i32, i32) {
    %c0_i32 = arith.constant 0 : i32
    %c0_i32_0 = arith.constant 0 : i32
    %c0_i32_1 = arith.constant 0 : i32
    return %c0_i32, %c0_i32_0 : i32, i32
  }
  func.func @transform_5(%arg0: i32, %arg1: i32) -> (i32, i32) {
    %c0_i32 = arith.constant 0 : i32
    %c0_i32_0 = arith.constant 0 : i32
    %c0_i32_1 = arith.constant 0 : i32
    return %c0_i32, %c0_i32_0 : i32, i32
  }
  func.func @transform_6(%arg0: i32, %arg1: i32) -> (i32, i32) {
    %c0_i32 = arith.constant 0 : i32
    %c0_i32_0 = arith.constant 0 : i32
    %c0_i32_1 = arith.constant 0 : i32
    return %c0_i32, %c0_i32_0 : i32, i32
  }
  func.func @transform_7(%arg0: i32, %arg1: i32) -> (i32, i32) {
    %c0_i32 = arith.constant 0 : i32
    %c0_i32_0 = arith.constant 0 : i32
    %c0_i32_1 = arith.constant 0 : i32
    return %c0_i32, %c0_i32_0 : i32, i32
  }
  func.func @transform_8(%arg0: i32, %arg1: i32) -> (i32, i32) {
    %c0_i32 = arith.constant 0 : i32
    %c0_i32_0 = arith.constant 0 : i32
    %c0_i32_1 = arith.constant 0 : i32
    return %c0_i32, %c0_i32_0 : i32, i32
  }
  func.func @transform_9(%arg0: i32, %arg1: i32) -> (i32, i32, i32) {
    %c0_i32 = arith.constant 0 : i32
    %c0_i32_0 = arith.constant 0 : i32
    return %arg0, %arg1, %c0_i32 : i32, i32, i32
  }
}

</mosaic_0001>

<bundles_post_ra>
// kernel: embedder_forward.2
= control target key start
LH: loop header
LB: loop body
LE: loop exit
PB: predicated region body
PF: predicated region fallthrough
CT: control target
= control target key end

     0   :  { %v490_v1 = vmov 0.0   ;;  %vm491_vm0 = vmmov 0   ;;  %s616_s0 = inlined_call_operand.vmem [shape: bf16[1,16,80], index: 0, kind: input, shape index: {}]   ;;  %s617_s1 = inlined_call_operand.vmem [shape: f32[1,1,64], index: 1, kind: input, shape index: {}]   ;;  %s618_s2 = inlined_call_operand.vmem [shape: bf16[80,64], index: 2, kind: input, shape index: {}]   ;;  %s619_s3 = inlined_call_operand.vmem [shape: bf16[64,64], index: 3, kind: input, shape index: {}]   ;;  %s620_s4 = inlined_call_operand.vmem [shape: f32[1,64], index: 4, kind: input, shape index: {}]   ;;  %s621_s5 = inlined_call_operand.vmem [shape: bf16[64,64], index: 5, kind: input, shape index: {}]   ;;  %s622_s6 = inlined_call_operand.vmem [shape: f32[1,64], index: 6, kind: input, shape index: {}]   ;;  %s623_s7 = inlined_call_operand.vmem [shape: f32[1,64], index: 7, kind: input, shape index: {}]   ;;  %s624_s8 = inlined_call_operand.vmem [shape: f32[1,64], index: 8, kind: input, shape index: {}]   ;;  %s625_s9 = inlined_call_operand.hbm [shape: f32[1,16,64], index: 9, kind: output, shape index: {}]  }
   0x1   :  { %v450_v0 = vld [vmem:[%s618_s2 + $0x20] sm:$0xff]   ;;  %407 = vmatprep.subr.bf16.mxu0 %v490_v1  ;;  %421 = vmatprep.subr.bf16.mxu1 %v490_v1  ;;  %v451_v2 = vld [vmem:[%s618_s2 + $0x18] sm:$0xff]   ;;  %v452_v3 = vld [vmem:[%s618_s2 + $0x10] sm:$0xff]  }
   0x2   :  { %408 = vmatpush3.bf16.msra.mxu0 %v450_v0  ;;  %417 = vmatprep.mubr.msk.bf16.mxu0 %vm491_vm0, %v490_v1  ;;  %v456_v4 = vld [vmem:[%s619_s3 + $0x18] sm:$0xff]   ;;  %v453_v5 = vld [vmem:[%s618_s2 + $0x8] sm:$0xff]  }
   0x3   :  { %409 = vmatprep.subr.bf16.mxu0 %v490_v1  ;;  %429 = vmatprep.mubr.msk.bf16.mxu1 %vm491_vm0, %v490_v1 }
   0x4   :  { %422 = vmatpush3.bf16.msra.mxu1 %v456_v4 }
   0x5   :  { %423 = vmatprep.subr.bf16.mxu1 %v490_v1 }
   0x6   :  { %410 = vmatpush3.bf16.msra.mxu0 %v451_v2 }
   0x7   :  { %411 = vmatprep.subr.bf16.mxu0 %v490_v1 }
   0xa   :  { %412 = vmatpush3.bf16.msra.mxu0 %v452_v3 }
   0xb   :  { %413 = vmatprep.subr.bf16.mxu0 %v490_v1 }
   0xc   :  { %14 = vsyncpa [#allocation3], 0  ;;  %v454_v6 = vld [vmem:[%s618_s2] sm:$0xff]   ;;  %vm88_vm1 = vcmask 654336   ;;  %v457_v8 = vld [vmem:[%s619_s3 + $0x10] sm:$0xff]   ;;  %vm175_vm2 = vcmask 523264  }
   0xd   :  { %v455_v7 = vld [vmem:[%s616_s0] sm:$0xff]   ;;  %424 = vmatpush3.bf16.msra.mxu1 %v457_v8  ;;  %v458_v9 = vld [vmem:[%s619_s3 + $0x8] sm:$0xff]   ;;  %v460_v20 = vld [vmem:[%s621_s5 + $0x18] sm:$0xff]   ;;  %s492_s19 = smov [#allocation2]  }
   0xe   :  { %414 = vmatpush3.bf16.msra.mxu0 %v453_v5  ;;  %425 = vmatprep.subr.bf16.mxu1 %v490_v1  ;;  %v459_v10 = vld [vmem:[%s619_s3] sm:$0xff]   ;;  %v461_v22 = vld [vmem:[%s621_s5 + $0x10] sm:$0xff]   ;;  %v462_v23 = vld [vmem:[%s621_s5 + $0x8] sm:$0xff]   ;;  %s358_s20 = sshll.u32 %s492_s19, 4  ;;  %s359_s20 = int_to_ptr.vmem [resolvable:$true] %s358_s20 }
   0xf   :  { %415 = vmatprep.subr.bf16.mxu0 %v490_v1  ;;  %v369_v11 = vld [vmem:[%s617_s1] ss:$0 sm:$0xff]  ;;  %s468_s21 = scalar_lea.vmem %s359_s20, 256  ;;  %p473_p1 = scmp.lt.s32.totalorder %s359_s20, %s359_s20 }
  0x10   :  { %v463_v24 = vld [vmem:[%s621_s5] sm:$0xff]   ;;  %p469_p0 = scmp.ne.s32.totalorder %s359_s20, %s468_s21  ;;  %p474_p2 = scmp.lt.s32.totalorder %s468_s21, %s468_s21 }
  0x11   :  { %426 = vmatpush3.bf16.msra.mxu1 %v458_v9  ;;  %v377_v25 = vld [vmem:[%s620_s4] ss:$0 sm:$0xff] }
  0x12   :  { %416 = vmatpush3.bf16.msra.mxu0 %v454_v6  ;;  %427 = vmatprep.subr.bf16.mxu1 %v490_v1  ;;  %v383_v35 = vld [vmem:[%s622_s6] ss:$0 sm:$0xff]  ;;  %p475_p3 = por %p474_p2, %p473_p1 }
  0x13   :  { %v389_v61 = vld [vmem:[%s623_s7] ss:$0 sm:$0xff] }
  0x14   :  { %v390_v63 = vld [vmem:[%s624_s8] ss:$0 sm:$0xff]  ;;  %p476_p4 = pnand %p475_p3, %p469_p0 }
  0x15   :  { %418 = vmatmul.mubr.msk.bf16.vlgmr.msra.gmra.mxu0 %vm88_vm1, %v455_v7  ;;  %428 = vmatpush3.bf16.msra.mxu1 %v459_v10 }
  0x16   :  { %433 = vmatprep.subr.bf16.mxu1 %v490_v1 }
  0xd5   :  { %v126_v12 = vpop.f32.mrf.mxu0 }
  0xd6   :  { %v127_v14 = vadd.f32 %v369_v11, %v126_v12 }
  0xd7   :  { %v419_v13 = vpop.f32.mrf.mxu0 }
  0xd8   :  { %v133_v18 = vmax.f32 %v127_v14, 0.0 }
  0xd9   :  { %v129_v15 = vpop.f32.mrf.mxu0 }
  0xda   :  { %v130_v16 = vadd.f32 %v369_v11, %v129_v15 }
  0xdb   :  { %v420_v17 = vpop.f32.mrf.mxu0 }
  0xdc   :  { %v134_v19 = vmax.f32 %v130_v16, 0.0 }
  0xde   :  { %v135_v21 = vpack.c.bf16 %v134_v19, %v133_v18 }
  0xe0   :  { %430 = vmatmul.mubr.msk.bf16.vlgmr.msra.gmra.mxu1 %vm175_vm2, %v135_v21 }
  0xe1   :  { %434 = vmatpush3.bf16.msra.mxu1 %v460_v20  ;;  %441 = vmatprep.mubr.msk.bf16.mxu1 %vm491_vm0, %v490_v1 }
  0xe2   :  { %435 = vmatprep.subr.bf16.mxu1 %v490_v1 }
  0xe5   :  { %436 = vmatpush3.bf16.msra.mxu1 %v461_v22 }
  0xe6   :  { %437 = vmatprep.subr.bf16.mxu1 %v490_v1 }
  0xe9   :  { %438 = vmatpush3.bf16.msra.mxu1 %v462_v23 }
  0xea   :  { %439 = vmatprep.subr.bf16.mxu1 %v490_v1 }
  0xed   :  { %440 = vmatpush3.bf16.msra.mxu1 %v463_v24 }
 0x1a0   :  { %v213_v26 = vpop.f32.mrf.mxu1 }
 0x1a1   :  { %v214_v28 = vadd.f32 %v377_v25, %v213_v26 }
 0x1a2   :  { %v431_v27 = vpop.f32.mrf.mxu1 }
 0x1a3   :  { %v220_v32 = vmax.f32 %v214_v28, 0.0 }
 0x1a4   :  { %v216_v29 = vpop.f32.mrf.mxu1 }
 0x1a5   :  { %v217_v30 = vadd.f32 %v377_v25, %v216_v29 }
 0x1a6   :  { %v432_v31 = vpop.f32.mrf.mxu1 }
 0x1a7   :  { %v221_v33 = vmax.f32 %v217_v30, 0.0 }
 0x1a9   :  { %v222_v34 = vpack.c.bf16 %v221_v33, %v220_v32 }
 0x1ab   :  { %442 = vmatmul.mubr.msk.bf16.vlgmr.msra.gmra.mxu1 %vm175_vm2, %v222_v34 }
 0x26b   :  { %v299_v36 = vpop.f32.mrf.mxu1 }
 0x26c   :  { %v300_v37 = vadd.f32 %v383_v35, %v299_v36 }
 0x26d   :  { %v443_v38 = vpop.f32.mrf.mxu1 }
 0x26e   :  { %v306_v39 = vsel %vm175_vm2, %v300_v37, 0.0 }
 0x26f   :  { %307 = vadd.xlane.f32.xlu0 %v306_v39  ;;  %v302_v40 = vpop.f32.mrf.mxu1 }
 0x270   :  { %v303_v41 = vadd.f32 %v383_v35, %v302_v40 }
 0x271   :  { %v444_v42 = vpop.f32.mrf.mxu1 }
 0x272   :  { %v309_v43 = vsel %vm175_vm2, %v303_v41, 0.0 }
 0x273   :  { %310 = vadd.xlane.f32.xlu0 %v309_v43 }
 0x2f8   :  { %v308_v44 = vpop.xlane.xlu0 %307 }
 0x2f9   :  { %v313_v45 = vmul.f32 0.015625, %v308_v44 }
 0x2fb   :  { %v315_v46 = vsub.f32 %v300_v37, %v313_v45 }
 0x2fc   :  { %v311_v47 = vpop.xlane.xlu0 %310 }
 0x2fd   :  { %v314_v48 = vmul.f32 0.015625, %v311_v47  ;;  %v317_v49 = vmul.f32 %v315_v46, %v315_v46 }
 0x2ff   :  { %v316_v50 = vsub.f32 %v303_v41, %v314_v48  ;;  %v319_v51 = vsel %vm175_vm2, %v317_v49, 0.0 }
 0x300   :  { %320 = vadd.xlane.f32.xlu1 %v319_v51 }
 0x301   :  { %v318_v52 = vmul.f32 %v316_v50, %v316_v50 }
 0x303   :  { %v322_v53 = vsel %vm175_vm2, %v318_v52, 0.0 }
 0x304   :  { %323 = vadd.xlane.f32.xlu1 %v322_v53 }
 0x389   :  { %v321_v54 = vpop.xlane.xlu1 %320 }
 0x38a   :  { %v325_v55 = vmul.f32 0.015625, %v321_v54 }
 0x38c   :  { %v327_v56 = vadd.f32 1e-05, %v325_v55 }
 0x38d   :  { %v324_v57 = vpop.xlane.xlu1 %323 }
 0x38e   :  { %464 = vrsqrt.f32 %v327_v56  ;;  %v326_v58 = vmul.f32 0.015625, %v324_v57 }
 0x390   :  { %v328_v59 = vadd.f32 1e-05, %v326_v58 }
 0x392   :  { %466 = vrsqrt.f32 %v328_v59 }
 0x39b   :  { %v465_v60 = vpop.eup %464 }
 0x39c   :  { %v331_v62 = vmul.f32 %v465_v60, %v315_v46 }
 0x39e   :  { %v340_v0 = vmul.f32 %v389_v61, %v331_v62 }
 0x39f   :  { %v467_v1 = vpop.eup %466 }
 0x3a0   :  { %v332_v2 = vmul.f32 %v467_v1, %v316_v50  ;;  %v349_v3 = vadd.f32 %v390_v63, %v340_v0 }
 0x3a2   :  { %v341_v4 = vmul.f32 %v389_v61, %v332_v2  ;;  %351 = vst.msk [vmem:[#allocation2] sm:$0xff] %vm175_vm2, %v349_v3 }
 0x3a4   :  { %v350_v5 = vadd.f32 %v390_v63, %v341_v4 }
 0x3a6   :  { %352 = vst.msk [vmem:[#allocation2 + $0x8] sm:$0xff] %vm175_vm2, %v350_v5 }
 0x3a7   :  { %479 = shalt.err (!%p476_p4)
}
 0x3a8   :  { %s493_s7 = smov 128   ;;  %s494_s8 = smov 8  }
 0x3a9   :  { %364 = dma.vmem_to_hbm [thread:$0]  %s359_s20, 256, %s625_s9, [#allocation3], %s493_s7, %s493_s7, %s494_s8  }
 0x3aa   :  { %488 = dma.done.wait [#allocation3], 256  }
 0x3ab   :  { %489 = vsyncadd [#allocation3], 4294967040 }
 0x3ac   :  { %368 = vsyncpa [#allocation3], 1 }

// kernel: embedder_forward.3
= control target key start
LH: loop header
LB: loop body
LE: loop exit
PB: predicated region body
PF: predicated region fallthrough
CT: control target
= control target key end

     0   :  { %14 = vsyncpa [#allocation3], 0  ;;  %s1529_s0 = inlined_call_operand.vmem [shape: bf16[2,64,32], index: 0, kind: input, shape index: {}]   ;;  %s1530_s1 = inlined_call_operand.vmem [shape: f32[2,1,32], index: 1, kind: input, shape index: {}]   ;;  %s1531_s2 = inlined_call_operand.vmem [shape: bf16[32,32], index: 2, kind: input, shape index: {}]   ;;  %s1532_s3 = inlined_call_operand.vmem [shape: bf16[32,32], index: 3, kind: input, shape index: {}]   ;;  %s1533_s4 = inlined_call_operand.vmem [shape: f32[1,32], index: 4, kind: input, shape index: {}]   ;;  %s1534_s5 = inlined_call_operand.vmem [shape: bf16[32,32], index: 5, kind: input, shape index: {}]   ;;  %s1535_s6 = inlined_call_operand.vmem [shape: f32[1,32], index: 6, kind: input, shape index: {}]   ;;  %s1536_s7 = inlined_call_operand.vmem [shape: f32[1,32], index: 7, kind: input, shape index: {}]   ;;  %s1537_s8 = inlined_call_operand.vmem [shape: f32[1,32], index: 8, kind: input, shape index: {}]   ;;  %s1538_s9 = inlined_call_operand.hbm [shape: f32[2,64,32], index: 9, kind: output, shape index: {}]  }
   0x1   :  { %16 = vsyncpa [#allocation3 + $0x1], 0  ;;  %s1291_s30 = smov 0   ;;  %s1293_s10 = smov 0  }
   0x2   :  { %s1295_s11 = smov 0   ;;  %s1297_s12 = smov 0  }
   0x3   :  { %s1299_s13 = smov 0   ;;  %s1301_s14 = smov 0  }
   0x4 LB: > { %s977_s15 = sadd.s32 4294967295, %s1236_s14   ;;  %s978_s16 = sadd.s32 4294967294, %s1236_s14   ;;  %s1236_s14 = sphi %s1301_s14, %s22_s14   ;;  %s1232_s13 = sphi %s1299_s13, %s1545_s13   ;;  %s1228_s12 = sphi %s1297_s12, %s1544_s12   ;;  %s1224_s11 = sphi %s1295_s11, %s1543_s11   ;;  %s1220_s10 = sphi %s1293_s10, %s1542_s10   ;;  %s1216_s30 = sphi %s1291_s30, %s1541_s30  }
   0x5   : > { %s34_s17 = sadd.s32 1, %s1232_s13  ;;  %s244_s18 = sadd.s32 1, %s1224_s11 }
   0x6   : > { %p36_p0 = scmp.ge.s32.totalorder %s34_s17, 2  ;;  %p254_p1 = scmp.ne.s32.totalorder %s1224_s11, %s1220_s10 }
   0x7   : > { %p255_p2 = scmp.eq.s32.totalorder %s977_s15, 1  ;;  %p260_p3 = scmp.ne.s32.totalorder %s1220_s10, %s1216_s30 }
   0x8   : > { %s1547_s17 = smov (%p36_p0, %s34_s17), 0  ;;  %p261_p5 = scmp.eq.s32.totalorder %s978_s16, 1 }
   0x9   : > { %p1331_p4 = por %p255_p2, %p254_p1  ;;  %s239_s20 = ssub.s32 %s1232_s13, %s1547_s17 }
   0xa   : > { %p981_p6 = scmp.ge.s32.totalorder %s1236_s14, 1  ;;  %p242_p7 = scmp.eq.s32.totalorder %s239_s20, 0 }
   0xb   : > { %p1338_p8 = por %p261_p5, %p260_p3  ;;  %p319_p9 = scmp.lt.s32.totalorder %s1236_s14, 3 }
   0xc   : > { %s1344_s22 = scalar_select %p242_p7, %s1224_s11, %s244_s18  }
   0xd   : > { %p320_p10 = pnand %p981_p6, %p319_p9 }
   0xe   : > { %p363_p11 = scmp.lt.s32.totalorder (!%p320_p10), %s1228_s12, 1  ;;  %s359_s25 = sand.u32 (!%p320_p10), 1, %s1220_s10  }
   0xf   : > { %323 = sbr.rel (%p320_p10) target bundleno = 976 (0x3d0), region = 56  ;;  %s1018_s18 = sshll.u32 (!%p320_p10), %s1228_s12, 10 }
  0x10   : > { %s1476_s26 = scalar_lea.hbm (!%p320_p10), %s1538_s9, %s1018_s18 }
  0x14   : > { %v1134_v0 = vld [vmem:[%s1531_s2 + $0x8] sm:$0xff]   ;;  %v1135_v1 = vld [vmem:[%s1531_s2] sm:$0xff]   ;;  %s364_s27 = scalar_select %p363_p11, %s1228_s12, 1  ;;  %vm428_vm0 = vcmask 261120  }
  0x15   : > { %1037 = vmatprep.subr.bf16.mxu0 %v1134_v0  ;;  %1073 = vmatprep.subr.bf16.mxu1 %v1134_v0  ;;  %v1140_v6 = vld [vmem:[%s1532_s3 + $0x8] sm:$0xff]   ;;  %v1141_v7 = vld [vmem:[%s1532_s3] sm:$0xff]   ;;  %s1484_s12 = scalar_lea.sflag [#allocation3], %s359_s25 }
  0x16   : > { %1038 = vmatpush3.bf16.msra.mxu0 %v1134_v0  ;;  %1075 = vmatpush3.bf16.msra.mxu1 %v1134_v0  ;;  %s1017_s28 = sshll.u32 %s364_s27, 5  ;;  %v1142_v37 = vld [vmem:[%s1534_s5 + $0x8] sm:$0xff]   ;;  %v1143_v38 = vld [vmem:[%s1534_s5] sm:$0xff]  }
  0x17   : > { %1039 = vmatprep.subr.bf16.mxu0 %v1135_v1  ;;  %1074 = vmatprep.subr.bf16.mxu1 %v1135_v1  ;;  %s370_s16 = scalar_lea.vmem %s1529_s0, %s1017_s28  ;;  %s374_s28 = scalar_lea.vmem %s1530_s1, %s364_s27  ;;  %v996_v41 = vld [vmem:[%s1533_s4] ss:$0 sm:$0xff] }
  0x18   : > { %v1136_v2 = vld [vmem:[%s370_s16] sm:$0xff]   ;;  %v1137_v3 = vld [vmem:[%s370_s16 + $0x8] sm:$0xff]   ;;  %v1138_v4 = vld [vmem:[%s370_s16 + $0x10] sm:$0xff]   ;;  %s982_s27 = sshll.u32 %s359_s25, 6 }
  0x19   : > { %1041 = vmatprep.mubr.msk.bf16.mxu0 %vm428_vm0, %v1136_v2  ;;  %v1139_v5 = vld [vmem:[%s370_s16 + $0x18] sm:$0xff]   ;;  %1045 = vmatprep.mubr.msk.bf16.mxu1 %vm428_vm0, %v1138_v4  ;;  %v985_v11 = vld [vmem:[%s374_s28] ss:$0 sm:$0xff]  ;;  %s1450_s16 = scalar_lea.vmem [#allocation2], %s982_s27  ;;  %s1238_s27 = smov [#allocation2]  }
  0x1a   : > { %1040 = vmatpush3.bf16.msra.mxu0 %v1135_v1  ;;  %1076 = vmatpush3.bf16.msra.mxu1 %v1135_v1  ;;  %v1003_v4 = vld [vmem:[%s1535_s6] ss:$0 sm:$0xff]  ;;  %s889_s20 = sshll.u32 %s1450_s16, 4  ;;  %s1164_s29 = sshll.u32 %s1238_s27, 4  ;;  %s1478_s20 = int_to_ptr.vmem [resolvable:$true] %s889_s20  ;;  %s1165_s29 = int_to_ptr.vmem [resolvable:$false] %s1164_s29 }
  0x1b   : > { %1049 = vmatprep.subr.bf16.mxu1 %v1140_v6  ;;  %1061 = vmatprep.subr.bf16.mxu0 %v1142_v37  ;;  %s1160_s28 = scalar_lea.vmem %s1478_s20, 1024  ;;  %s1166_s15 = scalar_lea.vmem %s1165_s29, 2048 }
  0x1c   : > { %p1161_p12 = scmp.ne.s32.totalorder %s1478_s20, %s1160_s28  ;;  %p1167_p1 = scmp.lt.s32.totalorder %s1478_s20, %s1165_s29 }
  0x1d   : > { %1042 = vmatmul.mubr.msk.bf16.vlgmr.msra.gmra.mxu0 %vm428_vm0, %v1137_v3  ;;  %1046 = vmatmul.mubr.msk.bf16.vlgmr.msra.gmra.mxu1 %vm428_vm0, %v1139_v5  ;;  %p1168_p2 = scmp.lt.s32.totalorder %s1166_s15, %s1160_s28 }
  0x1e   : > { %1050 = vmatpush3.bf16.msra.mxu1 %v1140_v6  ;;  %1062 = vmatpush3.bf16.msra.mxu0 %v1142_v37  ;;  %p1162_p13 = pnand %p1161_p12, %p1331_p4 }
  0x1f   : > { %1051 = vmatprep.subr.bf16.mxu1 %v1141_v7  ;;  %1063 = vmatprep.subr.bf16.mxu0 %v1143_v38  ;;  %p1169_p3 = por %p1168_p2, %p1167_p1 }
  0x20   : > { %p1163_p0 = pneg %p1162_p13 }
  0x22   : > { %1052 = vmatpush3.bf16.msra.mxu1 %v1141_v7  ;;  %1064 = vmatpush3.bf16.msra.mxu0 %v1143_v38  ;;  %p1170_p5 = pnand %p1169_p3, %p1163_p0 }
  0xdd   : > { %v1043_v8 = vpop.f32.mrf.mxu0  ;;  %v1047_v9 = vpop.f32.mrf.mxu1 }
  0xde   : > { %v484_v18 = vadd.f32 %v1043_v8, %v985_v11  ;;  %v500_v30 = vadd.f32 %v1047_v9, %v985_v11 }
  0xdf   : > { %v475_v10 = vpop.f32.mrf.mxu0  ;;  %v491_v12 = vpop.f32.mrf.mxu1 }
  0xe0   : > { %v492_v14 = vadd.f32 %v985_v11, %v491_v12  ;;  %v476_v15 = vadd.f32 %v985_v11, %v475_v10  ;;  %v508_v27 = vmax.f32 %v484_v18, 0.0  ;;  %v512_v34 = vmax.f32 %v500_v30, 0.0 }
  0xe1   : > { %v1044_v13 = vpop.f32.mrf.mxu0  ;;  %v1048_v17 = vpop.f32.mrf.mxu1 }
  0xe2   : > { %v487_v16 = vadd.f32 %v1044_v13, %v985_v11  ;;  %v510_v23 = vmax.f32 %v492_v14, 0.0  ;;  %v506_v25 = vmax.f32 %v476_v15, 0.0  ;;  %v503_v32 = vadd.f32 %v1048_v17, %v985_v11 }
  0xe3   : > { %v478_v19 = vpop.f32.mrf.mxu0  ;;  %v494_v21 = vpop.f32.mrf.mxu1 }
  0xe4   : > { %v479_v20 = vadd.f32 %v985_v11, %v478_v19  ;;  %v509_v22 = vmax.f32 %v487_v16, 0.0  ;;  %v495_v24 = vadd.f32 %v985_v11, %v494_v21  ;;  %v513_v35 = vmax.f32 %v503_v32, 0.0 }
  0xe6   : > { %v507_v26 = vmax.f32 %v479_v20, 0.0  ;;  %v511_v28 = vmax.f32 %v495_v24, 0.0  ;;  %v515_v31 = vpack.c.bf16 %v509_v22, %v508_v27  ;;  %v517_v36 = vpack.c.bf16 %v513_v35, %v512_v34 }
  0xe8   : > { %v514_v29 = vpack.c.bf16 %v507_v26, %v506_v25  ;;  %v516_v33 = vpack.c.bf16 %v511_v28, %v510_v23 }
  0xea   : > { %1053 = vmatprep.mubr.msk.bf16.mxu1 %vm428_vm0, %v514_v29 }
  0xeb   : > { %1054 = vmatmul.mubr.msk.bf16.vlgmr.msra.gmra.mxu1 %vm428_vm0, %v515_v31 }
  0xec   : > { %1057 = vmatprep.mubr.msk.bf16.mxu1 %vm428_vm0, %v516_v33 }
  0xf3   : > { %1058 = vmatmul.mubr.msk.bf16.gmra.mxu1 %vm428_vm0, %v517_v36 }
 0x1ab   : > { %v1055_v39 = vpop.f32.mrf.mxu1 }
 0x1ac   : > { %v596_v45 = vadd.f32 %v1055_v39, %v996_v41 }
 0x1ad   : > { %v587_v40 = vpop.f32.mrf.mxu1 }
 0x1ae   : > { %v588_v43 = vadd.f32 %v996_v41, %v587_v40  ;;  %v620_v52 = vmax.f32 %v596_v45, 0.0 }
 0x1af   : > { %v1056_v42 = vpop.f32.mrf.mxu1 }
 0x1b0   : > { %v599_v44 = vadd.f32 %v1056_v42, %v996_v41  ;;  %v618_v50 = vmax.f32 %v588_v43, 0.0 }
 0x1b1   : > { %v590_v46 = vpop.f32.mrf.mxu1 }
 0x1b2   : > { %v591_v47 = vadd.f32 %v996_v41, %v590_v46  ;;  %v621_v48 = vmax.f32 %v599_v44, 0.0 }
 0x1b3   : > { %v1059_v49 = vpop.f32.mrf.mxu1 }
 0x1b4   : > { %v619_v51 = vmax.f32 %v591_v47, 0.0  ;;  %v627_v55 = vpack.c.bf16 %v621_v48, %v620_v52  ;;  %v612_v59 = vadd.f32 %v1059_v49, %v996_v41 }
 0x1b5   : > { %v603_v53 = vpop.f32.mrf.mxu1 }
 0x1b6   : > { %v626_v54 = vpack.c.bf16 %v619_v51, %v618_v50  ;;  %v604_v57 = vadd.f32 %v996_v41, %v603_v53  ;;  %v624_v1 = vmax.f32 %v612_v59, 0.0 }
 0x1b7   : > { %v1060_v56 = vpop.f32.mrf.mxu1 }
 0x1b8   : > { %v615_v58 = vadd.f32 %v1060_v56, %v996_v41  ;;  %1065 = vmatprep.mubr.msk.bf16.mxu0 %vm428_vm0, %v626_v54  ;;  %v622_v63 = vmax.f32 %v604_v57, 0.0 }
 0x1b9   : > { %v606_v60 = vpop.f32.mrf.mxu1  ;;  %1066 = vmatmul.mubr.msk.bf16.vlgmr.msra.gmra.mxu0 %vm428_vm0, %v627_v55 }
 0x1ba   : > { %v607_v61 = vadd.f32 %v996_v41, %v606_v60  ;;  %v625_v62 = vmax.f32 %v615_v58, 0.0 }
 0x1bc   : > { %v623_v0 = vmax.f32 %v607_v61, 0.0  ;;  %v629_v3 = vpack.c.bf16 %v625_v62, %v624_v1 }
 0x1be   : > { %v628_v2 = vpack.c.bf16 %v623_v0, %v622_v63 }
 0x1c0   : > { %1069 = vmatprep.mubr.msk.bf16.mxu0 %vm428_vm0, %v628_v2 }
 0x1c1   : > { %1070 = vmatmul.mubr.msk.bf16.gmra.mxu0 %vm428_vm0, %v629_v3 }
 0x279   : > { %v1067_v5 = vpop.f32.mrf.mxu0 }
 0x27a   : > { %v708_v6 = vadd.f32 %v1067_v5, %v1003_v4 }
 0x27b   : > { %v699_v7 = vpop.f32.mrf.mxu0 }
 0x27c   : > { %v700_v8 = vadd.f32 %v1003_v4, %v699_v7  ;;  %v736_v9 = vsel %vm428_vm0, %v708_v6, 0.0 }
 0x27d   : > { %737 = vadd.xlane.f32.xlu1 %v736_v9  ;;  %v1068_v10 = vpop.f32.mrf.mxu0 }
 0x27e   : > { %v711_v11 = vadd.f32 %v1068_v10, %v1003_v4  ;;  %v730_v12 = vsel %vm428_vm0, %v700_v8, 0.0 }
 0x27f   : > { %v702_v13 = vpop.f32.mrf.mxu0  ;;  %731 = vadd.xlane.f32.xlu0 %v730_v12 }
 0x280   : > { %v703_v14 = vadd.f32 %v1003_v4, %v702_v13  ;;  %v739_v15 = vsel %vm428_vm0, %v711_v11, 0.0 }
 0x281   : > { %740 = vadd.xlane.f32.xlu1 %v739_v15  ;;  %v1071_v16 = vpop.f32.mrf.mxu0 }
 0x282   : > { %v733_v17 = vsel %vm428_vm0, %v703_v14, 0.0  ;;  %v724_v21 = vadd.f32 %v1071_v16, %v1003_v4 }
 0x283   : > { %v715_v18 = vpop.f32.mrf.mxu0  ;;  %734 = vadd.xlane.f32.xlu0 %v733_v17 }
 0x284   : > { %v716_v19 = vadd.f32 %v1003_v4, %v715_v18  ;;  %v748_v27 = vsel %vm428_vm0, %v724_v21, 0.0 }
 0x285   : > { %v1072_v20 = vpop.f32.mrf.mxu0 }
 0x286   : > { %v742_v22 = vsel %vm428_vm0, %v716_v19, 0.0  ;;  %v727_v25 = vadd.f32 %v1072_v20, %v1003_v4 }
 0x287   : > { %v718_v23 = vpop.f32.mrf.mxu0  ;;  %743 = vadd.xlane.f32.xlu0 %v742_v22 }
 0x288   : > { %v719_v24 = vadd.f32 %v1003_v4, %v718_v23  ;;  %v751_v28 = vsel %vm428_vm0, %v727_v25, 0.0 }
 0x28a   : > { %v745_v26 = vsel %vm428_vm0, %v719_v24, 0.0 }
 0x28b   : > { %746 = vadd.xlane.f32.xlu1 %v745_v26  ;;  %749 = vadd.xlane.f32.xlu0 %v748_v27  ;;  %v1010_v27 = vld [vmem:[%s1536_s7] ss:$0 sm:$0xff] }
 0x28f   : > { %752 = vadd.xlane.f32.xlu1 %v751_v28 }
 0x306   : > { %v738_v29 = vpop.xlane.xlu1 %737 }
 0x307   : > { %v757_v30 = vmul.f32 0.03125, %v738_v29 }
 0x308   : > { %v732_v31 = vpop.xlane.xlu0 %731 }
 0x309   : > { %v1398_v32 = vsub.f32 %v708_v6, %v757_v30  ;;  %v755_v33 = vmul.f32 0.03125, %v732_v31  ;;  %v1011_v31 = vld [vmem:[%s1537_s8] ss:$0 sm:$0xff] }
 0x30a   : > { %v741_v34 = vpop.xlane.xlu1 %740 }
 0x30b   : > { %v1400_v35 = vsub.f32 %v700_v8, %v755_v33  ;;  %v758_v36 = vmul.f32 0.03125, %v741_v34  ;;  %v773_v37 = vmul.f32 %v1398_v32, %v1398_v32 }
 0x30c   : > { %v735_v38 = vpop.xlane.xlu0 %734 }
 0x30d   : > { %v1404_v39 = vsub.f32 %v711_v11, %v758_v36  ;;  %v756_v40 = vmul.f32 0.03125, %v735_v38  ;;  %v785_v41 = vsel %vm428_vm0, %v773_v37, 0.0  ;;  %v771_v42 = vmul.f32 %v1400_v35, %v1400_v35 }
 0x30e   : > { %786 = vadd.xlane.f32.xlu0 %v785_v41 }
 0x30f   : > { %v1409_v43 = vsub.f32 %v703_v14, %v756_v40  ;;  %v774_v44 = vmul.f32 %v1404_v39, %v1404_v39  ;;  %v779_v48 = vsel %vm428_vm0, %v771_v42, 0.0 }
 0x310   : > { %v744_v45 = vpop.xlane.xlu0 %743 }
 0x311   : > { %v759_v46 = vmul.f32 0.03125, %v744_v45  ;;  %v788_v47 = vsel %vm428_vm0, %v774_v44, 0.0  ;;  %v772_v49 = vmul.f32 %v1409_v43, %v1409_v43 }
 0x312   : > { %789 = vadd.xlane.f32.xlu1 %v788_v47  ;;  %780 = vadd.xlane.f32.xlu0 %v779_v48 }
 0x313   : > { %v1417_v50 = vsub.f32 %v716_v19, %v759_v46  ;;  %v782_v55 = vsel %vm428_vm0, %v772_v49, 0.0 }
 0x314   : > { %v747_v51 = vpop.xlane.xlu1 %746  ;;  %v750_v52 = vpop.xlane.xlu0 %749 }
 0x315   : > { %v760_v53 = vmul.f32 0.03125, %v747_v51  ;;  %v761_v54 = vmul.f32 0.03125, %v750_v52  ;;  %v775_v56 = vmul.f32 %v1417_v50, %v1417_v50 }
 0x316   : > { %783 = vadd.xlane.f32.xlu1 %v782_v55 }
 0x317   : > { %v1422_v57 = vsub.f32 %v719_v24, %v760_v53  ;;  %v1424_v58 = vsub.f32 %v724_v21, %v761_v54  ;;  %v791_v59 = vsel %vm428_vm0, %v775_v56, 0.0 }
 0x318   : > { %v753_v60 = vpop.xlane.xlu1 %752  ;;  %792 = vadd.xlane.f32.xlu0 %v791_v59 }
 0x319   : > { %v762_v61 = vmul.f32 0.03125, %v753_v60  ;;  %v776_v62 = vmul.f32 %v1422_v57, %v1422_v57  ;;  %v777_v63 = vmul.f32 %v1424_v58, %v1424_v58 }
 0x31b   : > { %v1431_v0 = vsub.f32 %v727_v25, %v762_v61  ;;  %v794_v1 = vsel %vm428_vm0, %v776_v62, 0.0  ;;  %v797_v2 = vsel %vm428_vm0, %v777_v63, 0.0 }
 0x31c   : > { %795 = vadd.xlane.f32.xlu1 %v794_v1  ;;  %798 = vadd.xlane.f32.xlu0 %v797_v2 }
 0x31d   : > { %v778_v3 = vmul.f32 %v1431_v0, %v1431_v0 }
 0x31f   : > { %v800_v4 = vsel %vm428_vm0, %v778_v3, 0.0 }
 0x320   : > { %801 = vadd.xlane.f32.xlu1 %v800_v4 }
 0x397   : > { %v787_v5 = vpop.xlane.xlu0 %786 }
 0x398   : > { %v805_v6 = vmul.f32 0.03125, %v787_v5 }
 0x39a   : > { %v813_v7 = vadd.f32 1e-05, %v805_v6 }
 0x39b   : > { %v790_v8 = vpop.xlane.xlu1 %789  ;;  %v781_v9 = vpop.xlane.xlu0 %780 }
 0x39c   : > { %1144 = vrsqrt.f32 %v813_v7  ;;  %v806_v10 = vmul.f32 0.03125, %v790_v8  ;;  %v803_v11 = vmul.f32 0.03125, %v781_v9 }
 0x39e   : > { %v814_v12 = vadd.f32 1e-05, %v806_v10  ;;  %v811_v13 = vadd.f32 1e-05, %v803_v11 }
 0x39f   : > { %v784_v14 = vpop.xlane.xlu1 %783 }
 0x3a0   : > { %1146 = vrsqrt.f32 %v814_v12  ;;  %v804_v15 = vmul.f32 0.03125, %v784_v14 }
 0x3a1   : > { %1148 = vrsqrt.f32 %v811_v13  ;;  %v793_v16 = vpop.xlane.xlu0 %792 }
 0x3a2   : > { %v812_v17 = vadd.f32 1e-05, %v804_v15  ;;  %v807_v18 = vmul.f32 0.03125, %v793_v16 }
 0x3a4   : > { %1150 = vrsqrt.f32 %v812_v17  ;;  %v815_v19 = vadd.f32 1e-05, %v807_v18 }
 0x3a5   : > { %v796_v20 = vpop.xlane.xlu1 %795  ;;  %v799_v21 = vpop.xlane.xlu0 %798 }
 0x3a6   : > { %1152 = vrsqrt.f32 %v815_v19  ;;  %v808_v22 = vmul.f32 0.03125, %v796_v20  ;;  %v809_v23 = vmul.f32 0.03125, %v799_v21 }
 0x3a8   : > { %v816_v24 = vadd.f32 1e-05, %v808_v22  ;;  %v817_v25 = vadd.f32 1e-05, %v809_v23 }
 0x3a9   : > { %v1145_v26 = vpop.eup %1144  ;;  %v802_v28 = vpop.xlane.xlu1 %801 }
 0x3aa   : > { %v829_v29 = vmul.f32 %v1145_v26, %v1398_v32  ;;  %1154 = vrsqrt.f32 %v816_v24  ;;  %v810_v30 = vmul.f32 0.03125, %v802_v28 }
 0x3ab   : > { %1156 = vrsqrt.f32 %v817_v25 }
 0x3ac   : > { %v844_v33 = vmul.f32 %v1010_v27, %v829_v29  ;;  %v818_v34 = vadd.f32 1e-05, %v810_v30 }
 0x3ad   : > { %v1147_v36 = vpop.eup %1146 }
 0x3ae   : > { %v1149_v37 = vpop.eup %1148  ;;  %v859_v38 = vadd.f32 %v1011_v31, %v844_v33  ;;  %v830_v40 = vmul.f32 %v1147_v36, %v1404_v39  ;;  %1158 = vrsqrt.f32 %v818_v34 }
 0x3af   : > { %v827_v41 = vmul.f32 %v1149_v37, %v1400_v35 }
 0x3b0   : > { %867 = vst.msk [vmem:[%s1450_s16 + $0x10] sm:$0xff] %vm428_vm0, %v859_v38  ;;  %v845_v32 = vmul.f32 %v1010_v27, %v830_v40 }
 0x3b1   : > { %v1151_v42 = vpop.eup %1150  ;;  %v842_v44 = vmul.f32 %v1010_v27, %v827_v41 }
 0x3b2   : > { %v860_v45 = vadd.f32 %v1011_v31, %v845_v32  ;;  %v828_v46 = vmul.f32 %v1151_v42, %v1409_v43 }
 0x3b3   : > { %v1153_v47 = vpop.eup %1152  ;;  %v857_v39 = vadd.f32 %v1011_v31, %v842_v44 }
 0x3b4   : > { %868 = vst.msk [vmem:[%s1450_s16 + $0x18] sm:$0xff] %vm428_vm0, %v860_v45  ;;  %v843_v35 = vmul.f32 %v1010_v27, %v828_v46  ;;  %v831_v48 = vmul.f32 %v1153_v47, %v1417_v50 }
 0x3b5   : > { %865 = vst.msk [vmem:[%s1450_s16] sm:$0xff] %vm428_vm0, %v857_v39 }
 0x3b6   : > { %v858_v49 = vadd.f32 %v1011_v31, %v843_v35  ;;  %v846_v51 = vmul.f32 %v1010_v27, %v831_v48 }
 0x3b7   : > { %v1155_v52 = vpop.eup %1154 }
 0x3b8   : > { %v1157_v53 = vpop.eup %1156  ;;  %866 = vst.msk [vmem:[%s1450_s16 + $0x8] sm:$0xff] %vm428_vm0, %v858_v49  ;;  %v861_v43 = vadd.f32 %v1011_v31, %v846_v51  ;;  %v832_v54 = vmul.f32 %v1155_v52, %v1422_v57 }
 0x3b9   : > { %v833_v55 = vmul.f32 %v1157_v53, %v1424_v58 }
 0x3ba   : > { %869 = vst.msk [vmem:[%s1450_s16 + $0x20] sm:$0xff] %vm428_vm0, %v861_v43  ;;  %v847_v50 = vmul.f32 %v1010_v27, %v832_v54 }
 0x3bb   : > { %v1159_v56 = vpop.eup %1158  ;;  %v848_v59 = vmul.f32 %v1010_v27, %v833_v55 }
 0x3bc   : > { %v862_v60 = vadd.f32 %v1011_v31, %v847_v50  ;;  %v834_v61 = vmul.f32 %v1159_v56, %v1431_v0 }
 0x3bd   : > { %v863_v62 = vadd.f32 %v1011_v31, %v848_v59 }
 0x3be   : > { %870 = vst.msk [vmem:[%s1450_s16 + $0x28] sm:$0xff] %vm428_vm0, %v862_v60  ;;  %v849_v63 = vmul.f32 %v1010_v27, %v834_v61 }
 0x3bf   : > { %871 = vst.msk [vmem:[%s1450_s16 + $0x30] sm:$0xff] %vm428_vm0, %v863_v62 }
 0x3c0   : > { %v864_v57 = vadd.f32 %v1011_v31, %v849_v63 }
 0x3c2   : > { %872 = vst.msk [vmem:[%s1450_s16 + $0x38] sm:$0xff] %vm428_vm0, %v864_v57 }
 0x3c3   : > { %1173 = shalt.err (!%p1170_p5)
}
 0x3c4   : > { %s1174_s25 = scalar_lea.hbm %s1476_s26, 1024  ;;  %s1178_s23 = scalar_lea.hbm %s1538_s9, 2048 }
 0x3c5   : > { %p1175_p6 = scmp.ne.s32.totalorder %s1476_s26, %s1174_s25  ;;  %p1179_p10 = scmp.lt.s32.totalorder %s1476_s26, %s1538_s9 }
 0x3c6   : > { %p1180_p11 = scmp.lt.s32.totalorder %s1178_s23, %s1174_s25 }
 0x3c7   : > { %p1176_p7 = pnand %p1175_p6, %p1331_p4 }
 0x3c8   : > { %p1181_p12 = por %p1180_p11, %p1179_p10 }
 0x3c9   : > { %p1177_p9 = pneg %p1176_p7 }
 0x3cb   : > { %p1182_p13 = pnand %p1181_p12, %p1177_p9 }
 0x3cd   : > { %1185 = shalt.err (!%p1182_p13)
}
 0x3ce   : > { %s1239_s28 = smov 128   ;;  %s1240_s29 = smov 8  }
 0x3cf   : > { %1077 = dma.vmem_to_hbm [thread:$0]  (%p1331_p4), %s1478_s20, 1024, %s1476_s26, %s1484_s12, %s1239_s28, %s1239_s28, %s1240_s29  }
 0x3d0 PF: > { %p1083_p0 = scmp.ge.s32.totalorder %s1236_s14, 2  ;;  %s904_s15 = sand.u32 1, %s1216_s30  }
 0x3d1   : > { %s905_s25 = scalar_lea.sflag [#allocation3], %s904_s15 }
 0x3d2   : > { %p1080_p1 = pnand %p1083_p0, %p1338_p8 }
 0x3d4   : > { %p1081_p2 = pneg %p1080_p1 }
 0x3d6   : > { %1211 = dma.done.wait (%p1081_p2), %s905_s25, 1024  }
 0x3d7   : > { %1213 = vsyncadd (%p1081_p2), %s905_s25, 4294966272  ;;  %s22_s14 = sadd.s32 1, %s1236_s14   ;;  %s1541_s30 = smov %s1220_s10 }
 0x3d8   : > { %p19_p3 = scmp.ge.s32.totalorder %s22_s14, 4   ;;  %s1542_s10 = smov %s1224_s11 }
 0x3d9   : > { %s1543_s11 = smov %s1344_s22  ;;  %s1544_s12 = smov %s1232_s13 }
 0x3da   : > { %s1545_s13 = smov %s1547_s17  ;;  %21 = sbr.rel (!%p19_p3) target bundleno = 4 (0x4), region = 94 }
 0x3df   :  { %910 = vsyncpa [#allocation3], 1 }
 0x3e0   :  { %912 = vsyncpa [#allocation3 + $0x1], 1 }

</bundles_post_ra>
